<compile_context>
chip_gen: v7x
topology: tpu7x:2x2x1
jax: 0.10.0
libtpu: 0.0.40
codegen_flags: <defaults>
</compile_context>

<pallas_src>
import functools

import jax
import jax.numpy as jnp
from jax.experimental import pallas as pl
from jax.experimental.pallas import tpu as pltpu

_H = 32  # hidden dim padded from 30 to a sublane multiple


def _round_up(n, m):
    return ((n + m - 1) // m) * m


def _leaky_relu(v, negative_slope=0.01):
    # Matches torch.nn.functional.leaky_relu default slope.
    return jnp.where(v >= 0, v, negative_slope * v)


def densenet_kernel(x_ref,
                    w1_ref, b1_ref,
                    w2_ref, b2_ref,
                    w3_ref, b3_ref,
                    w4_ref, b4_ref,
                    o_ref):
    x = x_ref[...]                                  # (2, Bt)   f32
    w1 = w1_ref[...]                                # (32, 2)

    # Layer 1: K=2 -> two broadcast multiply-adds on the VPU (skip the MXU).
    h = w1[:, 0:1] * x[0:1, :] + w1[:, 1:2] * x[1:2, :] + b1_ref[...]   # (32, Bt)
    h = _leaky_relu(h)

    # Layers 2 & 3: 32x32 matmuls on the MXU, feature-major (W @ h).
    h = jnp.dot(w2_ref[...], h, preferred_element_type=jnp.float32) + b2_ref[...]
    h = _leaky_relu(h)

    h = jnp.dot(w3_ref[...], h, preferred_element_type=jnp.float32) + b3_ref[...]
    h = _leaky_relu(h)

    # Layer 4: M=1 -> sublane reduction on the VPU/XLU instead of the MXU.
    y = jnp.sum(w4_ref[...] * h, axis=0, keepdims=True) + b4_ref[...]   # (1, Bt)
    o_ref[...] = y.astype(o_ref.dtype)


@functools.partial(jax.jit, static_argnames=("block_batch",))
def densenet_forward(x, params, *, block_batch=2048):
    """x: (B, 2) float32.  params: PyTorch-convention dict of (out, in)
    weights and (out,) biases.  All layout plumbing (transpose, hidden pad to
    32, batch pad to the tile size) is glue done here."""
    B = x.shape[0]
    H = _H

    # Feature-major weights (out, in) with the hidden dim zero-padded to 32.
    w1 = jnp.zeros((H, 2), jnp.float32).at[:30, :].set(params["w1"])
    b1 = jnp.zeros((H, 1), jnp.float32).at[:30, 0].set(params["b1"])
    w2 = jnp.zeros((H, H), jnp.float32).at[:30, :30].set(params["w2"])
    b2 = jnp.zeros((H, 1), jnp.float32).at[:30, 0].set(params["b2"])
    w3 = jnp.zeros((H, H), jnp.float32).at[:30, :30].set(params["w3"])
    b3 = jnp.zeros((H, 1), jnp.float32).at[:30, 0].set(params["b3"])
    w4 = jnp.zeros((H, 1), jnp.float32).at[:30, 0].set(params["w4"][0])
    b4 = params["b4"].reshape(1, 1).astype(jnp.float32)

    # Batch tile on the lane axis; pad batch up to a multiple of the tile.
    Bt = min(block_batch, _round_up(max(B, 1), 128))
    Bp = _round_up(B, Bt)
    x_t = jnp.zeros((2, Bp), jnp.float32).at[:, :B].set(x.T)

    const = lambda shape: pl.BlockSpec(shape, lambda i: (0, 0))

    flops = B * (2 * 2 * 30 + 2 * 30 * 30 + 2 * 30 * 30 + 2 * 30)
    bytes_accessed = 4 * B * (2 + 1) + 4 * (30 * 2 + 2 * 30 * 30 + 30 + 3 * 30 + 1)

    out = pl.pallas_call(
        densenet_kernel,
        out_shape=jax.ShapeDtypeStruct((1, Bp), jnp.float32),
        grid_spec=pltpu.PrefetchScalarGridSpec(
            num_scalar_prefetch=0,
            grid=(Bp // Bt,),
            in_specs=[
                pl.BlockSpec((2, Bt), lambda i: (0, i)),   # x tile (streamed)
                const((H, 2)),  const((H, 1)),             # w1, b1 (resident)
                const((H, H)),  const((H, 1)),             # w2, b2
                const((H, H)),  const((H, 1)),             # w3, b3
                const((H, 1)),  const((1, 1)),             # w4, b4
            ],
            out_specs=pl.BlockSpec((1, Bt), lambda i: (0, i)),
        ),
        compiler_params=pltpu.CompilerParams(
            dimension_semantics=("parallel",)),
        cost_estimate=pl.CostEstimate(
            flops=flops, transcendentals=0, bytes_accessed=bytes_accessed),
    )(x_t, w1, b1, w2, b2, w3, b3, w4, b4)

    return out[0, :B].reshape(B, 1)


def init_params(key):
    """Deterministic synthetic init matching nn.Linear shapes (PyTorch conv)."""
    ks = jax.random.split(key, 8)

    def u(k, shape, fan_in):
        bound = 1.0 / jnp.sqrt(fan_in)
        return jax.random.uniform(k, shape, jnp.float32, -bound, bound)

    return {
        "w1": u(ks[0], (30, 2), 2),   "b1": u(ks[1], (30,), 2),
        "w2": u(ks[2], (30, 30), 30), "b2": u(ks[3], (30,), 30),
        "w3": u(ks[4], (30, 30), 30), "b3": u(ks[5], (30,), 30),
        "w4": u(ks[6], (1, 30), 30),  "b4": u(ks[7], (1,), 30),
    }


def reference_forward(x, p):
    h = _leaky_relu(x @ p["w1"].T + p["b1"])
    h = _leaky_relu(h @ p["w2"].T + p["b2"])
    h = _leaky_relu(h @ p["w3"].T + p["b3"])
    return h @ p["w4"].T + p["b4"]


if __name__ == "__main__":
    key = jax.random.PRNGKey(0)
    k_x, k_p = jax.random.split(key)

    batch = 8
    x = jax.random.normal(k_x, (batch, 2), jnp.float32)
    params = init_params(k_p)

    out = densenet_forward(x, params)
    out = jax.block_until_ready(out)

    ref = reference_forward(x, params)
    assert out.shape == (batch, 1), out.shape
    assert jnp.allclose(out, ref, atol=1e-5, rtol=1e-5), (out, ref)

    print("KERNEL_OK")
</pallas_src>

<mosaic_0001>
module attributes {stable_mosaic.version = 11 : i64} {
  func.func @densenet_kernel(%arg0: i32, %arg1: memref<2x128xf32, #tpu.memory_space<vmem>>, %arg2: memref<32x2xf32, #tpu.memory_space<vmem>>, %arg3: memref<32x1xf32, #tpu.memory_space<vmem>>, %arg4: memref<32x32xf32, #tpu.memory_space<vmem>>, %arg5: memref<32x1xf32, #tpu.memory_space<vmem>>, %arg6: memref<32x32xf32, #tpu.memory_space<vmem>>, %arg7: memref<32x1xf32, #tpu.memory_space<vmem>>, %arg8: memref<32x1xf32, #tpu.memory_space<vmem>>, %arg9: memref<1x1xf32, #tpu.memory_space<vmem>>, %arg10: memref<1x128xf32, #tpu.memory_space<vmem>>) attributes {dimension_semantics = [#tpu.dimension_semantics<parallel>], iteration_bounds = array<i64: 1>, scalar_prefetch = 0 : i64, scratch_operands = 0 : i64, tpu.core_type = #tpu.core_type<tc>, window_params = [{transform_indices = @transform_0, window_bounds = array<i64: 2, 128>}, {pipeline_mode = #tpu.pipeline_mode<synchronous>, transform_indices = @transform_1, window_bounds = array<i64: 32, 2>}, {pipeline_mode = #tpu.pipeline_mode<synchronous>, transform_indices = @transform_2, window_bounds = array<i64: 32, 1>}, {pipeline_mode = #tpu.pipeline_mode<synchronous>, transform_indices = @transform_3, window_bounds = array<i64: 32, 32>}, {pipeline_mode = #tpu.pipeline_mode<synchronous>, transform_indices = @transform_4, window_bounds = array<i64: 32, 1>}, {pipeline_mode = #tpu.pipeline_mode<synchronous>, transform_indices = @transform_5, window_bounds = array<i64: 32, 32>}, {pipeline_mode = #tpu.pipeline_mode<synchronous>, transform_indices = @transform_6, window_bounds = array<i64: 32, 1>}, {pipeline_mode = #tpu.pipeline_mode<synchronous>, transform_indices = @transform_7, window_bounds = array<i64: 32, 1>}, {pipeline_mode = #tpu.pipeline_mode<synchronous>, transform_indices = @transform_8, window_bounds = array<i64: 1, 1>}, {transform_indices = @transform_9, window_bounds = array<i64: 1, 128>}]} {
    %c0 = arith.constant 0 : index
    %c0_0 = arith.constant 0 : index
    %0 = vector.load %arg1[%c0, %c0_0] : memref<2x128xf32, #tpu.memory_space<vmem>>, vector<2x128xf32>
    %c0_1 = arith.constant 0 : index
    %c0_2 = arith.constant 0 : index
    %1 = vector.load %arg2[%c0_1, %c0_2] : memref<32x2xf32, #tpu.memory_space<vmem>>, vector<32x2xf32>
    %2 = vector.extract_strided_slice %1 {offsets = [0, 0], sizes = [32, 1], strides = [1, 1]} : vector<32x2xf32> to vector<32x1xf32>
    %3 = vector.extract_strided_slice %0 {offsets = [0, 0], sizes = [1, 128], strides = [1, 1]} : vector<2x128xf32> to vector<1x128xf32>
    %4 = vector.broadcast %2 : vector<32x1xf32> to vector<32x128xf32>
    %5 = vector.broadcast %3 : vector<1x128xf32> to vector<32x128xf32>
    %6 = arith.mulf %4, %5 : vector<32x128xf32>
    %7 = vector.extract_strided_slice %1 {offsets = [0, 1], sizes = [32, 1], strides = [1, 1]} : vector<32x2xf32> to vector<32x1xf32>
    %8 = vector.extract_strided_slice %0 {offsets = [1, 0], sizes = [1, 128], strides = [1, 1]} : vector<2x128xf32> to vector<1x128xf32>
    %9 = vector.broadcast %7 : vector<32x1xf32> to vector<32x128xf32>
    %10 = vector.broadcast %8 : vector<1x128xf32> to vector<32x128xf32>
    %11 = arith.mulf %9, %10 : vector<32x128xf32>
    %12 = arith.addf %6, %11 : vector<32x128xf32>
    %c0_3 = arith.constant 0 : index
    %c0_4 = arith.constant 0 : index
    %13 = vector.load %arg3[%c0_3, %c0_4] : memref<32x1xf32, #tpu.memory_space<vmem>>, vector<32x1xf32>
    %14 = vector.broadcast %13 : vector<32x1xf32> to vector<32x128xf32>
    %15 = arith.addf %12, %14 : vector<32x128xf32>
    %cst = arith.constant 0.000000e+00 : f32
    %16 = vector.broadcast %cst : f32 to vector<32x128xf32>
    %17 = arith.cmpf oge, %15, %16 : vector<32x128xf32>
    %cst_5 = arith.constant 0.00999999977 : f32
    %18 = vector.broadcast %cst_5 : f32 to vector<32x128xf32>
    %19 = arith.mulf %18, %15 : vector<32x128xf32>
    %20 = arith.select %17, %15, %19 : vector<32x128xi1>, vector<32x128xf32>
    %c0_6 = arith.constant 0 : index
    %c0_7 = arith.constant 0 : index
    %21 = vector.load %arg4[%c0_6, %c0_7] : memref<32x32xf32, #tpu.memory_space<vmem>>, vector<32x32xf32>
    %cst_8 = arith.constant dense<0.000000e+00> : vector<32x128xf32>
    %22 = tpu.matmul %21, %20, %cst_8 {dimension_numbers = #tpu.dot_dimension_numbers<[1], [0], [0], [1], [0, 0, 1, 1], [], []>} : vector<32x32xf32>, vector<32x128xf32>, vector<32x128xf32> -> vector<32x128xf32>
    %c0_9 = arith.constant 0 : index
    %c0_10 = arith.constant 0 : index
    %23 = vector.load %arg5[%c0_9, %c0_10] : memref<32x1xf32, #tpu.memory_space<vmem>>, vector<32x1xf32>
    %24 = vector.broadcast %23 : vector<32x1xf32> to vector<32x128xf32>
    %25 = arith.addf %22, %24 : vector<32x128xf32>
    %cst_11 = arith.constant 0.000000e+00 : f32
    %26 = vector.broadcast %cst_11 : f32 to vector<32x128xf32>
    %27 = arith.cmpf oge, %25, %26 : vector<32x128xf32>
    %cst_12 = arith.constant 0.00999999977 : f32
    %28 = vector.broadcast %cst_12 : f32 to vector<32x128xf32>
    %29 = arith.mulf %28, %25 : vector<32x128xf32>
    %30 = arith.select %27, %25, %29 : vector<32x128xi1>, vector<32x128xf32>
    %c0_13 = arith.constant 0 : index
    %c0_14 = arith.constant 0 : index
    %31 = vector.load %arg6[%c0_13, %c0_14] : memref<32x32xf32, #tpu.memory_space<vmem>>, vector<32x32xf32>
    %cst_15 = arith.constant dense<0.000000e+00> : vector<32x128xf32>
    %32 = tpu.matmul %31, %30, %cst_15 {dimension_numbers = #tpu.dot_dimension_numbers<[1], [0], [0], [1], [0, 0, 1, 1], [], []>} : vector<32x32xf32>, vector<32x128xf32>, vector<32x128xf32> -> vector<32x128xf32>
    %c0_16 = arith.constant 0 : index
    %c0_17 = arith.constant 0 : index
    %33 = vector.load %arg7[%c0_16, %c0_17] : memref<32x1xf32, #tpu.memory_space<vmem>>, vector<32x1xf32>
    %34 = vector.broadcast %33 : vector<32x1xf32> to vector<32x128xf32>
    %35 = arith.addf %32, %34 : vector<32x128xf32>
    %cst_18 = arith.constant 0.000000e+00 : f32
    %36 = vector.broadcast %cst_18 : f32 to vector<32x128xf32>
    %37 = arith.cmpf oge, %35, %36 : vector<32x128xf32>
    %cst_19 = arith.constant 0.00999999977 : f32
    %38 = vector.broadcast %cst_19 : f32 to vector<32x128xf32>
    %39 = arith.mulf %38, %35 : vector<32x128xf32>
    %40 = arith.select %37, %35, %39 : vector<32x128xi1>, vector<32x128xf32>
    %c0_20 = arith.constant 0 : index
    %c0_21 = arith.constant 0 : index
    %41 = vector.load %arg8[%c0_20, %c0_21] : memref<32x1xf32, #tpu.memory_space<vmem>>, vector<32x1xf32>
    %42 = vector.broadcast %41 : vector<32x1xf32> to vector<32x128xf32>
    %43 = arith.mulf %42, %40 : vector<32x128xf32>
    %cst_22 = arith.constant dense<0.000000e+00> : vector<128xf32>
    %44 = vector.multi_reduction <add>, %43, %cst_22 [0] : vector<32x128xf32> to vector<128xf32>
    %45 = vector.shape_cast %44 : vector<128xf32> to vector<1x128xf32>
    %c0_23 = arith.constant 0 : index
    %c0_24 = arith.constant 0 : index
    %46 = vector.load %arg9[%c0_23, %c0_24] : memref<1x1xf32, #tpu.memory_space<vmem>>, vector<1x1xf32>
    %47 = vector.broadcast %46 : vector<1x1xf32> to vector<1x128xf32>
    %48 = arith.addf %45, %47 : vector<1x128xf32>
    %c0_25 = arith.constant 0 : index
    %c0_26 = arith.constant 0 : index
    %49 = vector.load %arg10[%c0_25, %c0_26] : memref<1x128xf32, #tpu.memory_space<vmem>>, vector<1x128xf32>
    tpu.vector_store %arg10[%c0_25, %c0_26], %48 {strides = array<i32>} : memref<1x128xf32, #tpu.memory_space<vmem>>, vector<1x128xf32>,
    return
  }
  func.func @transform_0(%arg0: i32) -> (i32, i32) {
    %c0_i32 = arith.constant 0 : i32
    %c0_i32_0 = arith.constant 0 : i32
    return %c0_i32, %arg0 : i32, i32
  }
  func.func @transform_1(%arg0: i32) -> (i32, i32) {
    %c0_i32 = arith.constant 0 : i32
    %c0_i32_0 = arith.constant 0 : i32
    %c0_i32_1 = arith.constant 0 : i32
    return %c0_i32, %c0_i32_0 : i32, i32
  }
  func.func @transform_2(%arg0: i32) -> (i32, i32) {
    %c0_i32 = arith.constant 0 : i32
    %c0_i32_0 = arith.constant 0 : i32
    %c0_i32_1 = arith.constant 0 : i32
    return %c0_i32, %c0_i32_0 : i32, i32
  }
  func.func @transform_3(%arg0: i32) -> (i32, i32) {
    %c0_i32 = arith.constant 0 : i32
    %c0_i32_0 = arith.constant 0 : i32
    %c0_i32_1 = arith.constant 0 : i32
    return %c0_i32, %c0_i32_0 : i32, i32
  }
  func.func @transform_4(%arg0: i32) -> (i32, i32) {
    %c0_i32 = arith.constant 0 : i32
    %c0_i32_0 = arith.constant 0 : i32
    %c0_i32_1 = arith.constant 0 : i32
    return %c0_i32, %c0_i32_0 : i32, i32
  }
  func.func @transform_5(%arg0: i32) -> (i32, i32) {
    %c0_i32 = arith.constant 0 : i32
    %c0_i32_0 = arith.constant 0 : i32
    %c0_i32_1 = arith.constant 0 : i32
    return %c0_i32, %c0_i32_0 : i32, i32
  }
  func.func @transform_6(%arg0: i32) -> (i32, i32) {
    %c0_i32 = arith.constant 0 : i32
    %c0_i32_0 = arith.constant 0 : i32
    %c0_i32_1 = arith.constant 0 : i32
    return %c0_i32, %c0_i32_0 : i32, i32
  }
  func.func @transform_7(%arg0: i32) -> (i32, i32) {
    %c0_i32 = arith.constant 0 : i32
    %c0_i32_0 = arith.constant 0 : i32
    %c0_i32_1 = arith.constant 0 : i32
    return %c0_i32, %c0_i32_0 : i32, i32
  }
  func.func @transform_8(%arg0: i32) -> (i32, i32) {
    %c0_i32 = arith.constant 0 : i32
    %c0_i32_0 = arith.constant 0 : i32
    %c0_i32_1 = arith.constant 0 : i32
    return %c0_i32, %c0_i32_0 : i32, i32
  }
  func.func @transform_9(%arg0: i32) -> (i32, i32) {
    %c0_i32 = arith.constant 0 : i32
    %c0_i32_0 = arith.constant 0 : i32
    return %c0_i32, %arg0 : i32, i32
  }
}

</mosaic_0001>

<bundles_post_ra>
// kernel: densenet_forward.1
= control target key start
LH: loop header
LB: loop body
LE: loop exit
PB: predicated region body
PF: predicated region fallthrough
CT: control target
= control target key end

     0   :  { %v539_v0 = vmov 1   ;;  %v540_v5 = vmov 0   ;;  %vm163_vm0 = vcmask 261120   ;;  %v59_v25 = vlaneseq  ;;  %s700_s1 = inlined_call_operand.vmem [shape: f32[32,2], index: 1, kind: input, shape index: {}]   ;;  %s701_s8 = inlined_call_operand.<no memory space> [shape: f32[1,1], index: 8, kind: input, shape index: {}]   ;;  %s702_s2 = inlined_call_operand.vmem [shape: f32[32,1], index: 2, kind: input, shape index: {}]   ;;  %s703_s4 = inlined_call_operand.vmem [shape: f32[32,1], index: 4, kind: input, shape index: {}]   ;;  %s704_s6 = inlined_call_operand.vmem [shape: f32[32,1], index: 6, kind: input, shape index: {}]   ;;  %s705_s7 = inlined_call_operand.vmem [shape: f32[32,1], index: 7, kind: input, shape index: {}]   ;;  %s706_s3 = inlined_call_operand.vmem [shape: f32[32,32], index: 3, kind: input, shape index: {}]   ;;  %s707_s0 = inlined_call_operand.vmem [shape: f32[2,128], index: 0, kind: input, shape index: {}]   ;;  %s708_s5 = inlined_call_operand.vmem [shape: f32[32,32], index: 5, kind: input, shape index: {}]   ;;  %s709_s9 = inlined_call_operand.vmem [shape: f32[1,128], index: 9, kind: output, shape index: {}]  }
   0x1   :  { %535 = vset.pattern.permute.xlu0 %v539_v0  ;;  %533 = vset.pattern.permute.xlu1 %v539_v0  ;;  %v37_v1 = vld [vmem:[%s700_s1 + $0x10] sm:$0xff]  ;;  %v35_v2 = vld [vmem:[%s700_s1] sm:$0xff]  ;;  %v14_v3 = vstv %s701_s8  ;;  %v36_v4 = vld [vmem:[%s700_s1 + $0x8] sm:$0xff] }
   0x2   :  { %76 = vperm.xlu0 %535, %v37_v1   ;;  %68 = vperm.xlu1 %533, %v35_v2   ;;  %15 = vst [vmem:[#allocation2] sm:$0x1] %v14_v3  ;;  %v38_v6 = vld [vmem:[%s700_s1 + $0x18] sm:$0xff]  ;;  %v96_v7 = vld [vmem:[%s702_s2 + $0x8] sm:$0xff]  ;;  %v95_v8 = vld [vmem:[%s702_s2] sm:$0xff]  ;;  %v658_v28 = vshrl.u32 %v59_v25, 7 }
   0x3   :  { %v139_v9 = vld [vmem:[%s703_s4] sm:$0xff]  ;;  %v97_v10 = vld [vmem:[%s702_s2 + $0x10] sm:$0xff]  ;;  %v98_v12 = vld [vmem:[%s702_s2 + $0x18] sm:$0xff] }
   0x4   :  { %v141_v11 = vld [vmem:[%s703_s4 + $0x10] sm:$0xff]  ;;  %v277_v13 = vld [vmem:[%s704_s6] sm:$0xff]  ;;  %v140_v14 = vld [vmem:[%s703_s4 + $0x8] sm:$0xff]  ;;  %v61_v31 = vsub.s32 0, %v658_v28  ;;  %v85_v32 = vsub.s32 1, %v658_v28 }
   0x5   :  { %v279_v15 = vld [vmem:[%s704_s6 + $0x10] sm:$0xff]  ;;  %v142_v16 = vld [vmem:[%s703_s4 + $0x18] sm:$0xff]  ;;  %v410_v17 = vld [vmem:[%s705_s7] sm:$0xff] }
   0x6   :  { %536 = vset.pattern.permute.xlu0 %v540_v5  ;;  %72 = vperm.xlu1 %533, %v36_v4   ;;  %v278_v18 = vld [vmem:[%s704_s6 + $0x8] sm:$0xff]  ;;  %v135_v19 = vld [vmem:[%s706_s3] sm:$0xff]  ;;  %v412_v20 = vld [vmem:[%s705_s7 + $0x10] sm:$0xff] }
   0x7   :  { %41 = vperm.xlu0 %536, %v35_v2   ;;  %495 = vmatprep.mubr.msk.f32.mxu0 %vm163_vm0, %v135_v19  ;;  %v280_v21 = vld [vmem:[%s704_s6 + $0x18] sm:$0xff]  ;;  %v411_v23 = vld [vmem:[%s705_s7 + $0x8] sm:$0xff]  ;;  %v34_v33 = vld [vmem:[%s707_s0] sm:$0x3] }
   0x8   :  { %v413_v24 = vld [vmem:[%s705_s7 + $0x18] sm:$0xff]  ;;  %v62_v36 = vrot.slane %v34_v33, %v61_v31  ;;  %v86_v37 = vrot.slane %v34_v33, %v85_v32 }
   0x9   :  { %v447_v22 = vld [vmem:[#allocation2] sm:$0x1] }
   0xa   :  { %534 = vset.pattern.permute.xlu1 %v540_v5 }
   0xb   :  { %46 = vperm.xlu0 %536, %v36_v4   ;;  %56 = vperm.xlu1 %534, %v38_v6  }
   0xf   :  { %51 = vperm.xlu0 %536, %v37_v1   ;;  %537 = vset.pattern.permute.xlu1 %v539_v0 }
  0x10   :  { %80 = vperm.xlu1 %537, %v38_v6   ;;  %v136_v6 = vld [vmem:[%s706_s3 + $0x8] sm:$0xff] }
  0x13   :  { %106 = vperm.xlu0 %536, %v96_v7   ;;  %v137_v7 = vld [vmem:[%s706_s3 + $0x10] sm:$0xff] }
  0x14   :  { %538 = vset.pattern.permute.xlu1 %v540_v5 }
  0x15   :  { %101 = vperm.xlu1 %538, %v95_v8   ;;  %v138_v8 = vld [vmem:[%s706_s3 + $0x18] sm:$0xff] }
  0x17   :  { %145 = vperm.xlu0 %536, %v139_v9   ;;  %v273_v9 = vld [vmem:[%s708_s5] sm:$0xff] }
  0x18   :  { %509 = vmatprep.mubr.msk.f32.mxu1 %vm163_vm0, %v273_v9 }
  0x19   :  { %111 = vperm.xlu1 %538, %v97_v10  }
  0x1b   :  { %155 = vperm.xlu0 %536, %v141_v11  }
  0x1d   :  { %116 = vperm.xlu1 %538, %v98_v12  }
  0x1f   :  { %283 = vperm.xlu0 %536, %v277_v13  }
  0x21   :  { %150 = vperm.xlu1 %538, %v140_v14  }
  0x23   :  { %293 = vperm.xlu0 %536, %v279_v15  }
  0x25   :  { %160 = vperm.xlu1 %538, %v142_v16  }
  0x27   :  { %416 = vperm.xlu0 %536, %v410_v17  }
  0x29   :  { %288 = vperm.xlu1 %538, %v278_v18  }
  0x2b   :  { %426 = vperm.xlu0 %536, %v412_v20  }
  0x2d   :  { %298 = vperm.xlu1 %538, %v280_v21  }
  0x2f   :  { %450 = vperm.xlu0 %536, %v447_v22  }
  0x31   :  { %421 = vperm.xlu1 %538, %v411_v23  }
  0x35   :  { %431 = vperm.xlu1 %538, %v413_v24  }
  0x81   :  { %v69_v26 = vpop.permute.xlu1 %68  ;;  %v77_v27 = vpop.permute.xlu0 %76 }
  0x82   :  { %v87_v43 = vmul.f32 %v86_v37, %v69_v26  ;;  %v89_v50 = vmul.f32 %v86_v37, %v77_v27 }
  0x85   :  { %v73_v29 = vpop.permute.xlu1 %72 }
  0x86   :  { %v42_v30 = vpop.permute.xlu0 %41  ;;  %v88_v40 = vmul.f32 %v86_v37, %v73_v29 }
  0x87   :  { %v63_v41 = vmul.f32 %v62_v36, %v42_v30 }
  0x89   :  { %v91_v48 = vadd.f32 %v87_v43, %v63_v41 }
  0x8a   :  { %v47_v34 = vpop.permute.xlu0 %46  ;;  %v57_v35 = vpop.permute.xlu1 %56 }
  0x8b   :  { %v64_v38 = vmul.f32 %v62_v36, %v47_v34  ;;  %v66_v57 = vmul.f32 %v62_v36, %v57_v35  ;;  %v274_v34 = vld [vmem:[%s708_s5 + $0x8] sm:$0xff]  ;;  %v275_v35 = vld [vmem:[%s708_s5 + $0x10] sm:$0xff] }
  0x8d   :  { %v92_v44 = vadd.f32 %v88_v40, %v64_v38 }
  0x8e   :  { %v52_v39 = vpop.permute.xlu0 %51 }
  0x8f   :  { %v81_v42 = vpop.permute.xlu1 %80  ;;  %v65_v46 = vmul.f32 %v62_v36, %v52_v39  ;;  %v276_v36 = vld [vmem:[%s708_s5 + $0x18] sm:$0xff] }
  0x90   :  { %v90_v53 = vmul.f32 %v86_v37, %v81_v42 }
  0x91   :  { %v93_v55 = vadd.f32 %v89_v50, %v65_v46 }
  0x92   :  { %v107_v45 = vpop.permute.xlu0 %106  ;;  %v94_v62 = vadd.f32 %v90_v53, %v66_v57 }
  0x93   :  { %v120_v47 = vadd.f32 %v107_v45, %v92_v44 }
  0x94   :  { %v102_v49 = vpop.permute.xlu1 %101 }
  0x95   :  { %v128_v51 = vmul.f32 0.01, %v120_v47  ;;  %v119_v52 = vadd.f32 %v102_v49, %v91_v48  ;;  %vm124_vm1 = vcmp.ge.f32.partialorder %v120_v47, 0.0 }
  0x96   :  { %v146_v11 = vpop.permute.xlu0 %145 }
  0x97   :  { %v127_v54 = vmul.f32 0.01, %v119_v52  ;;  %vm123_vm2 = vcmp.ge.f32.partialorder %v119_v52, 0.0  ;;  %v132_v60 = vsel %vm124_vm1, %v120_v47, %v128_v51 }
  0x98   :  { %v112_v56 = vpop.permute.xlu1 %111 }
  0x99   :  { %v121_v58 = vadd.f32 %v112_v56, %v93_v55  ;;  %v131_v59 = vsel %vm123_vm2, %v119_v52, %v127_v54 }
  0x9a   :  { %v515_v61 = vpack.c.bf16 %v132_v60, %v131_v59  ;;  %v156_v20 = vpop.permute.xlu0 %155 }
  0x9b   :  { %v129_v0 = vmul.f32 0.01, %v121_v58  ;;  %vm125_vm3 = vcmp.ge.f32.partialorder %v121_v58, 0.0 }
  0x9c   :  { %v117_v63 = vpop.permute.xlu1 %116  ;;  %516 = vmatprep.subr.bf16.mxu0 %v515_v61 }
  0x9d   :  { %v122_v1 = vadd.f32 %v117_v63, %v94_v62  ;;  %518 = vmatpush3.bf16.msra.mxu0 %v515_v61  ;;  %v133_v3 = vsel %vm125_vm3, %v121_v58, %v129_v0 }
  0x9e   :  { %v284_v37 = vpop.permute.xlu0 %283 }
  0x9f   :  { %vm126_vm4 = vcmp.ge.f32.partialorder %v122_v1, 0.0  ;;  %v130_v2 = vmul.f32 0.01, %v122_v1 }
  0xa0   :  { %v151_v10 = vpop.permute.xlu1 %150 }
  0xa1   :  { %v134_v4 = vsel %vm126_vm4, %v122_v1, %v130_v2 }
  0xa2   :  { %v519_v5 = vpack.c.bf16 %v134_v4, %v133_v3  ;;  %v294_v39 = vpop.permute.xlu0 %293 }
  0xa4   :  { %520 = vmatprep.subr.bf16.mxu0 %v519_v5  ;;  %v161_v17 = vpop.permute.xlu1 %160 }
  0xa5   :  { %522 = vmatpush3.bf16.msra.mxu0 %v519_v5 }
  0xa6   :  { %v417_v46 = vpop.permute.xlu0 %416 }
  0xa8   :  { %496 = vmatmul.mubr.msk.f32.vlgmr.msra.gmra.mrb[0].mxu0 %vm163_vm0, %v136_v6  ;;  %v289_v38 = vpop.permute.xlu1 %288 }
  0xa9   :  { %498 = vmatprep.mubr.msk.f32.mxu0 %vm163_vm0, %v137_v7 }
  0xaa   :  { %v427_v60 = vpop.permute.xlu0 %426 }
  0xac   :  { %499 = vmatmul.mubr.msk.f32.gmra.mrb[2].mxu0 %vm163_vm0, %v138_v8  ;;  %v299_v40 = vpop.permute.xlu1 %298 }
  0xae   :  { %v451_v8 = vpop.permute.xlu0 %450 }
  0xb0   :  { %v422_v49 = vpop.permute.xlu1 %421 }
  0xb4   :  { %v432_v0 = vpop.permute.xlu1 %431 }
 0x17b   :  { %v497_v12 = vpop.f32.mrb[0].mxu0 }
 0x17c   :  { %v248_v13 = vadd.f32 %v497_v12, %v151_v10  ;;  %v242_v14 = vpop.f32.mrb[1].mxu0  ;;  %v456_v10 = vrot.slane %v451_v8, %v61_v31 }
 0x17d   :  { %v243_v15 = vadd.f32 %v242_v14, %v146_v11 }
 0x17e   :  { %v266_v16 = vmul.f32 0.01, %v248_v13  ;;  %vm262_vm5 = vcmp.ge.f32.partialorder %v248_v13, 0.0 }
 0x17f   :  { %v265_v18 = vmul.f32 0.01, %v243_v15  ;;  %v500_v19 = vpop.f32.mrb[2].mxu0  ;;  %vm261_vm6 = vcmp.ge.f32.partialorder %v243_v15, 0.0 }
 0x180   :  { %v258_v21 = vadd.f32 %v500_v19, %v161_v17  ;;  %v252_v22 = vpop.f32.mrb[3].mxu0  ;;  %v270_v23 = vsel %vm262_vm5, %v248_v13, %v266_v16 }
 0x181   :  { %v253_v24 = vadd.f32 %v252_v22, %v156_v20  ;;  %v269_v25 = vsel %vm261_vm6, %v243_v15, %v265_v18 }
 0x182   :  { %vm264_vm7 = vcmp.ge.f32.partialorder %v258_v21, 0.0  ;;  %v268_v26 = vmul.f32 0.01, %v258_v21  ;;  %v523_v27 = vpack.c.bf16 %v270_v23, %v269_v25 }
 0x183   :  { %vm263_vm8 = vcmp.ge.f32.partialorder %v253_v24, 0.0  ;;  %v267_v29 = vmul.f32 0.01, %v253_v24 }
 0x184   :  { %524 = vmatprep.subr.bf16.mxu1 %v523_v27  ;;  %v272_v30 = vsel %vm264_vm7, %v258_v21, %v268_v26 }
 0x185   :  { %526 = vmatpush3.bf16.msra.mxu1 %v523_v27  ;;  %v271_v32 = vsel %vm263_vm8, %v253_v24, %v267_v29 }
 0x186   :  { %v527_v33 = vpack.c.bf16 %v272_v30, %v271_v32 }
 0x188   :  { %528 = vmatprep.subr.bf16.mxu1 %v527_v33 }
 0x189   :  { %530 = vmatpush3.bf16.msra.mxu1 %v527_v33 }
 0x18c   :  { %510 = vmatmul.mubr.msk.f32.vlgmr.msra.gmra.mrb[0].mxu1 %vm163_vm0, %v274_v34 }
 0x18d   :  { %512 = vmatprep.mubr.msk.f32.mxu1 %vm163_vm0, %v275_v35 }
 0x190   :  { %513 = vmatmul.mubr.msk.f32.gmra.mrb[2].mxu1 %vm163_vm0, %v276_v36 }
 0x25f   :  { %v511_v41 = vpop.f32.mrb[0].mxu1 }
 0x260   :  { %v385_v42 = vadd.f32 %v511_v41, %v289_v38  ;;  %v379_v43 = vpop.f32.mrb[1].mxu1 }
 0x261   :  { %v380_v44 = vadd.f32 %v379_v43, %v284_v37 }
 0x262   :  { %vm399_vm9 = vcmp.ge.f32.partialorder %v385_v42, 0.0  ;;  %v403_v45 = vmul.f32 0.01, %v385_v42 }
 0x263   :  { %vm398_vm10 = vcmp.ge.f32.partialorder %v380_v44, 0.0  ;;  %v402_v47 = vmul.f32 0.01, %v380_v44  ;;  %v514_v48 = vpop.f32.mrb[2].mxu1 }
 0x264   :  { %v407_v50 = vsel %vm399_vm9, %v385_v42, %v403_v45  ;;  %v395_v51 = vadd.f32 %v514_v48, %v299_v40  ;;  %v389_v52 = vpop.f32.mrb[3].mxu1 }
 0x265   :  { %v435_v53 = vmul.f32 %v422_v49, %v407_v50  ;;  %v406_v54 = vsel %vm398_vm10, %v380_v44, %v402_v47  ;;  %v390_v55 = vadd.f32 %v389_v52, %v294_v39 }
 0x266   :  { %v434_v56 = vmul.f32 %v417_v46, %v406_v54  ;;  %vm401_vm11 = vcmp.ge.f32.partialorder %v395_v51, 0.0  ;;  %v405_v57 = vmul.f32 0.01, %v395_v51 }
 0x267   :  { %vm400_vm12 = vcmp.ge.f32.partialorder %v390_v55, 0.0  ;;  %v404_v58 = vmul.f32 0.01, %v390_v55 }
 0x268   :  { %v438_v59 = vadd.f32 %v435_v53, %v434_v56  ;;  %v409_v61 = vsel %vm401_vm11, %v395_v51, %v405_v57 }
 0x269   :  { %v408_v62 = vsel %vm400_vm12, %v390_v55, %v404_v58  ;;  %v437_v1 = vmul.f32 %v432_v0, %v409_v61 }
 0x26a   :  { %v436_v63 = vmul.f32 %v427_v60, %v408_v62 }
 0x26c   :  { %v439_v2 = vadd.f32 %v438_v59, %v436_v63 }
 0x26e   :  { %v440_v3 = vadd.f32 %v439_v2, %v437_v1 }
 0x270   :  { %v441_v4 = vrot.slane %v440_v3, 4 }
 0x272   :  { %v442_v5 = vadd.f32 %v441_v4, %v440_v3 }
 0x274   :  { %v443_v6 = vrot.slane %v442_v5, 2 }
 0x276   :  { %v444_v7 = vadd.f32 %v443_v6, %v442_v5 }
 0x278   :  { %v445_v9 = vrot.slane %v444_v7, 1 }
 0x27a   :  { %v446_v11 = vadd.f32 %v445_v9, %v444_v7 }
 0x27c   :  { %v457_v12 = vadd.f32 %v456_v10, %v446_v11 }
 0x27e   :  { %458 = vst [vmem:[%s709_s9] sm:$0x1] %v457_v12 }

</bundles_post_ra>
